<compile_context>
chip_gen: v6e
topology: v6e:2x2x1
jax: 0.10.0
libtpu: 0.0.40
codegen_flags: <defaults>
</compile_context>

<pallas_src>
import functools

import jax
import jax.numpy as jnp
from jax.experimental import pallas as pl
from jax.experimental.pallas import tpu as pltpu

EPS = 1e-5      # PyTorch BatchNorm default eps


def _round_up(x, m):
    return ((x + m - 1) // m) * m


# ---------------------------------------------------------------------------
# Fused Pallas kernel: merged conv branches + masked max-pool + MLP head
# ---------------------------------------------------------------------------
def _fused_cnn_kernel(x_ref, w_ref, f32_ref, o_ref, *, k_max, kmf_pad):
    # x_ref   : (BP, S_ext, F) bf16   batch/seq zero-padded activations
    # w_ref   : (kmf_pad + 2*HP, HP) bf16 packed weights:
    #             rows [0 : k_max*F]            merged conv weight (taps zero-padded)
    #             rows [kmf_pad : kmf_pad+HP]   fc1 (BN1 folded), zero-padded
    #             rows [kmf_pad+HP : +2*HP]     fc2 (BN2 folded), zero-padded
    # f32_ref : (8, HP) f32  row0=conv bias(+BN-num shift), row1=b1, row2=b2,
    #                        row3=per-channel last-valid conv position
    # o_ref   : (BP, HP) f32  lane/sublane-dense output slab
    BP, S_ext, F = x_ref.shape
    HP = w_ref.shape[1]
    L = S_ext - k_max + 1          # max valid-conv length over all branches
    KMF = k_max * F

    x = x_ref[...]                                     # bf16, single load
    fp = f32_ref[...]                                  # (8, HP) f32
    cb, b1, b2, thr = fp[0:1, :], fp[1:2, :], fp[2:3, :], fp[3:4, :]

    # ---- all conv branches as ONE MXU pass ---------------------------------
    if F < 128:
        # tiny F: tap-concat on the lane axis -> single matmul with K = k_max*F
        xt = jnp.concatenate([x[:, j:j + L, :] for j in range(k_max)], axis=-1)
        acc = jax.lax.dot_general(
            xt, w_ref[0:KMF, :],
            dimension_numbers=(((2,), (0,)), ((), ())),
            preferred_element_type=jnp.float32)        # (BP, L, HP) f32
    else:
        # real F (v7x path): per-tap accumulation, no k-times copy of x in VMEM
        acc = jax.lax.dot_general(
            x[:, 0:L, :], w_ref[0:F, :],
            dimension_numbers=(((2,), (0,)), ((), ())),
            preferred_element_type=jnp.float32)
        for j in range(1, k_max):
            acc = acc + jax.lax.dot_general(
                x[:, j:j + L, :], w_ref[j * F:(j + 1) * F, :],
                dimension_numbers=(((2,), (0,)), ((), ())),
                preferred_element_type=jnp.float32)

    # ---- mask each branch's invalid trailing positions, global max-pool ----
    l_iota = jax.lax.broadcasted_iota(jnp.int32, (L, HP), 0).astype(jnp.float32)
    mask = jnp.where(l_iota <= thr, 0.0, -1e30)        # (L, HP)
    pooled = jnp.max(acc + mask[None], axis=1)         # (BP, HP)

    # relu / conv-bias after pool is exact (bias const over l, relu monotone)
    xh = jnp.maximum(pooled + cb, 0.0)
    # (dropout = identity in eval mode)

    # BN1 folded into fc1 -> ReLU ; BN2 folded into fc2 (folded offline)
    w1 = w_ref[kmf_pad:kmf_pad + HP, :]
    w2 = w_ref[kmf_pad + HP:kmf_pad + 2 * HP, :]
    h = jnp.maximum(
        jnp.dot(xh.astype(jnp.bfloat16), w1, preferred_element_type=jnp.float32) + b1,
        0.0)
    o_ref[...] = jnp.dot(h.astype(jnp.bfloat16), w2,
                         preferred_element_type=jnp.float32) + b2


def fused_cnn_call(embedded, prep, kernel_sizes, n_out):
    B, S, F = embedded.shape
    k_min, k_max = min(kernel_sizes), max(kernel_sizes)
    assert k_max <= S, "kernel_size must be <= sequence length"
    S_ext = S + (k_max - k_min)               # so every branch sees all its valid positions
    BP = _round_up(B, 8)                      # sublane-dense rows for fc matmuls / store
    HP = prep["w_slab"].shape[1]
    kmf_pad = _round_up(k_max * F, 8)

    # single up-front bf16 cast + batch/seq zero-pad of the only big input
    x = jnp.zeros((BP, S_ext, F), jnp.bfloat16)
    x = x.at[:B, :S, :].set(embedded.astype(jnp.bfloat16))

    vmem = pl.BlockSpec(memory_space=pltpu.MemorySpace.VMEM)
    out = pl.pallas_call(
        functools.partial(_fused_cnn_kernel, k_max=k_max, kmf_pad=kmf_pad),
        out_shape=jax.ShapeDtypeStruct((BP, HP), jnp.float32),
        in_specs=[vmem, vmem, vmem],
        out_specs=vmem,
    )(x, prep["w_slab"], prep["f32_slab"])
    return out[:B, :n_out]                    # slice padded batch rows / lanes


# ---------------------------------------------------------------------------
# Parameter construction (deterministic, synthetic)
# ---------------------------------------------------------------------------
def init_params(key, *, num_uniq_embeddings, embedding_dim, n_numerical_col,
                feature_dim, out_channels, kernel_sizes):
    H = len(kernel_sizes) * out_channels
    n_keys = 9 + 2 * len(kernel_sizes)
    keys = jax.random.split(key, n_keys)
    ki = iter(keys)
    params = {
        "embedding": jax.random.normal(next(ki), (num_uniq_embeddings, embedding_dim),
                                       jnp.float32) * 0.1,
        # BatchNorm1d(n_numerical_col) running stats / affine (eval mode)
        "bn_num": {
            "gamma": jnp.ones((n_numerical_col,), jnp.float32) * 1.1,
            "beta": jnp.full((n_numerical_col,), 0.05, jnp.float32),
            "mean": jax.random.normal(next(ki), (n_numerical_col,), jnp.float32) * 0.1,
            "var": jnp.abs(jax.random.normal(next(ki), (n_numerical_col,), jnp.float32)) + 0.5,
        },
        "convs": [],
        "bn1": {
            "gamma": jnp.ones((H,), jnp.float32),
            "beta": jnp.zeros((H,), jnp.float32),
            "mean": jax.random.normal(next(ki), (H,), jnp.float32) * 0.05,
            "var": jnp.abs(jax.random.normal(next(ki), (H,), jnp.float32)) * 0.2 + 0.8,
        },
        "fc1_w": jax.random.normal(next(ki), (H, H), jnp.float32) * 0.1,   # (in, out)
        "fc1_b": jnp.zeros((H,), jnp.float32),
        "bn2": {
            "gamma": jnp.ones((H,), jnp.float32) * 0.9,
            "beta": jnp.full((H,), -0.02, jnp.float32),
            "mean": jax.random.normal(next(ki), (H,), jnp.float32) * 0.05,
            "var": jnp.abs(jax.random.normal(next(ki), (H,), jnp.float32)) * 0.2 + 0.8,
        },
        "fc2_w": jax.random.normal(next(ki), (H, 2), jnp.float32) * 0.1,   # (in, out)
        "fc2_b": jnp.zeros((2,), jnp.float32),
    }
    for k in kernel_sizes:
        # stored tap-major: (k, F, O)   (PyTorch Conv1d weight is (O, F, k))
        w = jax.random.normal(next(ki), (k, feature_dim, out_channels), jnp.float32) * 0.1
        b = jax.random.normal(next(ki), (out_channels,), jnp.float32) * 0.01
        params["convs"].append((w, b))
    return params


# ---------------------------------------------------------------------------
# One-time parameter prep: fold eval BatchNorms (num/1/2), merge conv branches,
# lane-pad everything to 128 and pack into 2 slabs (1 bf16 weights, 1 f32 rows).
# ---------------------------------------------------------------------------
def prepare_params(params, kernel_sizes, feature_dim, out_channels,
                   n_numerical_col, seq_len, n_out=2):
    O, F, S = out_channels, feature_dim, seq_len
    H = len(kernel_sizes) * O
    k_min, k_max = min(kernel_sizes), max(kernel_sizes)
    KMF = k_max * F
    kmf_pad = _round_up(KMF, 8)
    L_max = S - k_min + 1
    HP = _round_up(H, 128)                 # lane-dense hidden / output width
    assert n_out <= HP

    # ---- fold eval BatchNorm1d(num) into the conv (conv is linear in its input) ----
    bn = params["bn_num"]
    s_num = bn["gamma"] * jax.lax.rsqrt(bn["var"] + EPS)
    t_num = bn["beta"] - bn["mean"] * s_num
    feat_scale = jnp.ones((F,), jnp.float32).at[:n_numerical_col].set(s_num)
    feat_shift = jnp.zeros((F,), jnp.float32).at[:n_numerical_col].set(t_num)

    # ---- merge all conv branches: zero-pad to k_max taps, concat on output dim ----
    Wc = jnp.zeros((kmf_pad, HP), jnp.float32)
    cb = jnp.zeros((HP,), jnp.float32)
    thr = jnp.full((HP,), float(L_max - 1), jnp.float32)   # padded cols: all positions "valid" (values are 0)
    for i, (k, (w0, b0)) in enumerate(zip(kernel_sizes, params["convs"])):
        w_scaled = w0 * feat_scale[None, :, None]           # BN-num scale -> weights
        delta = jnp.einsum("kfo,f->o", w0, feat_shift)      # BN-num shift -> bias
        Wc = Wc.at[:k * F, i * O:(i + 1) * O].set(w_scaled.reshape(k * F, O))
        cb = cb.at[i * O:(i + 1) * O].set(b0 + delta)
        thr = thr.at[i * O:(i + 1) * O].set(float(S - k))   # last valid conv position

    # ---- fold BN1 (eval) into fc1, BN2 (eval) into fc2 ----
    s1 = params["bn1"]["gamma"] * jax.lax.rsqrt(params["bn1"]["var"] + EPS)
    t1 = params["bn1"]["beta"] - params["bn1"]["mean"] * s1
    w1 = s1[:, None] * params["fc1_w"]
    b1 = t1 @ params["fc1_w"] + params["fc1_b"]
    s2 = params["bn2"]["gamma"] * jax.lax.rsqrt(params["bn2"]["var"] + EPS)
    t2 = params["bn2"]["beta"] - params["bn2"]["mean"] * s2
    w2 = s2[:, None] * params["fc2_w"]
    b2 = t2 @ params["fc2_w"] + params["fc2_b"]

    # ---- pack ALL matmul weights into one lane-dense bf16 slab (one DMA) ----
    w_slab = jnp.zeros((kmf_pad + 2 * HP, HP), jnp.float32)
    w_slab = w_slab.at[:kmf_pad, :].set(Wc)
    w_slab = w_slab.at[kmf_pad:kmf_pad + H, :H].set(w1)
    w_slab = w_slab.at[kmf_pad + HP:kmf_pad + HP + H, :n_out].set(w2)

    # ---- pack all f32 row vectors into one (8, HP) slab (one DMA) ----
    f32_slab = jnp.zeros((8, HP), jnp.float32)
    f32_slab = f32_slab.at[0, :].set(cb)
    f32_slab = f32_slab.at[1, :H].set(b1)
    f32_slab = f32_slab.at[2, :n_out].set(b2)
    f32_slab = f32_slab.at[3, :].set(thr)

    return {"w_slab": w_slab.astype(jnp.bfloat16), "f32_slab": f32_slab}


# ---------------------------------------------------------------------------
# Full forward (embedding/concat glue in plain JAX, hot path fused in Pallas)
# ---------------------------------------------------------------------------
def cnn_forward(params, prep, cat_idx, num_list, kernel_sizes):
    # cat_idx: (B, S, n_cat) int32; num_list: list of B arrays (S, n_numerical_col)
    emb = jnp.take(params["embedding"], cat_idx, axis=0)          # (B, S, n_cat, E)
    B, S = emb.shape[0], emb.shape[1]
    cat = emb.reshape(B, S, -1)                                   # (B, S, n_cat*E)
    num = jnp.stack(num_list, axis=0)                             # raw; BN-num folded into conv
    embedded = jnp.concatenate([num, cat], axis=-1)               # (B, S, feature_dim)
    return fused_cnn_call(embedded, prep, kernel_sizes, n_out=2)


# ---------------------------------------------------------------------------
# Pure-JAX f32 reference (PyTorch eval-mode semantics, no folds / no padding)
# ---------------------------------------------------------------------------
def reference_forward(params, cat_idx, num_list, kernel_sizes):
    emb = jnp.take(params["embedding"], cat_idx, axis=0)
    B, S = emb.shape[0], emb.shape[1]
    cat = emb.reshape(B, S, -1)
    bn = params["bn_num"]
    num = jnp.stack(
        [(n - bn["mean"]) * jax.lax.rsqrt(bn["var"] + EPS) * bn["gamma"] + bn["beta"]
         for n in num_list], axis=0)
    x = jnp.concatenate([num, cat], axis=-1)                      # (B, S, F)
    F = x.shape[-1]
    pooled = []
    for (w, b), k in zip(params["convs"], kernel_sizes):
        L = S - k + 1
        acc = jnp.stack(
            [x[:, l:l + k, :].reshape(B, k * F) @ w.reshape(k * F, -1)
             for l in range(L)], axis=1) + b                      # (B, L, O)
        pooled.append(jnp.max(jax.nn.relu(acc), axis=1))
    xh = jnp.concatenate(pooled, axis=-1)

    def bn_eval(v, p):
        return (v - p["mean"]) * jax.lax.rsqrt(p["var"] + EPS) * p["gamma"] + p["beta"]

    xh = bn_eval(xh, params["bn1"])                               # dropout = identity (eval)
    h = jax.nn.relu(xh @ params["fc1_w"] + params["fc1_b"])
    h = bn_eval(h, params["bn2"])
    return h @ params["fc2_w"] + params["fc2_b"]


# ---------------------------------------------------------------------------
if __name__ == "__main__":
    # small, module-consistent shapes
    num_uniq_embeddings = 10
    embedding_dim = 4
    n_cat_cols = 3
    n_numerical_col = 4
    feature_dim = n_numerical_col + n_cat_cols * embedding_dim    # 16
    out_channels = 8
    kernel_sizes = [2, 3]
    B, S = 2, 8

    root = jax.random.PRNGKey(0)
    k_par, k_cat, k_num = jax.random.split(root, 3)

    params = init_params(
        k_par,
        num_uniq_embeddings=num_uniq_embeddings,
        embedding_dim=embedding_dim,
        n_numerical_col=n_numerical_col,
        feature_dim=feature_dim,
        out_channels=out_channels,
        kernel_sizes=kernel_sizes,
    )
    prep = prepare_params(params, kernel_sizes, feature_dim, out_channels,
                          n_numerical_col, seq_len=S, n_out=2)

    cat_idx = jax.random.randint(k_cat, (B, S, n_cat_cols), 0, num_uniq_embeddings,
                                 dtype=jnp.int32)
    num_keys = jax.random.split(k_num, B)
    num_list = [jax.random.normal(nk, (S, n_numerical_col), jnp.float32)
                for nk in num_keys]

    out = cnn_forward(params, prep, cat_idx, num_list, kernel_sizes)
    out = jax.block_until_ready(out)
    assert out.shape == (B, 2) and out.dtype == jnp.float32

    ref = jax.block_until_ready(reference_forward(params, cat_idx, num_list, kernel_sizes))
    assert bool(jnp.allclose(out, ref, atol=5e-2, rtol=5e-2)), (out, ref)
    print("KERNEL_OK")
</pallas_src>

<mosaic_0001>
module attributes {stable_mosaic.version = 11 : i64} {
  func.func @_fused_cnn_kernel(%arg0: memref<8x9x16xbf16, #tpu.memory_space<vmem>>, %arg1: memref<304x128xbf16, #tpu.memory_space<vmem>>, %arg2: memref<8x128xf32, #tpu.memory_space<vmem>>, %arg3: memref<8x128xf32, #tpu.memory_space<vmem>>) attributes {dimension_semantics = [], scalar_prefetch = 0 : i64, scratch_operands = 0 : i64, tpu.core_type = #tpu.core_type<tc>} {
    %c0 = arith.constant 0 : index
    %c0_0 = arith.constant 0 : index
    %c0_1 = arith.constant 0 : index
    %0 = vector.load %arg0[%c0, %c0_0, %c0_1] : memref<8x9x16xbf16, #tpu.memory_space<vmem>>, vector<8x9x16xbf16>
    %c0_2 = arith.constant 0 : index
    %c0_3 = arith.constant 0 : index
    %1 = vector.load %arg2[%c0_2, %c0_3] : memref<8x128xf32, #tpu.memory_space<vmem>>, vector<8x128xf32>
    %2 = vector.extract_strided_slice %1 {offsets = [0, 0], sizes = [1, 128], strides = [1, 1]} : vector<8x128xf32> to vector<1x128xf32>
    %3 = vector.extract_strided_slice %1 {offsets = [1, 0], sizes = [1, 128], strides = [1, 1]} : vector<8x128xf32> to vector<1x128xf32>
    %4 = vector.extract_strided_slice %1 {offsets = [2, 0], sizes = [1, 128], strides = [1, 1]} : vector<8x128xf32> to vector<1x128xf32>
    %5 = vector.extract_strided_slice %1 {offsets = [3, 0], sizes = [1, 128], strides = [1, 1]} : vector<8x128xf32> to vector<1x128xf32>
    %6 = vector.extract_strided_slice %0 {offsets = [0, 0, 0], sizes = [8, 7, 16], strides = [1, 1, 1]} : vector<8x9x16xbf16> to vector<8x7x16xbf16>
    %7 = vector.extract_strided_slice %0 {offsets = [0, 1, 0], sizes = [8, 7, 16], strides = [1, 1, 1]} : vector<8x9x16xbf16> to vector<8x7x16xbf16>
    %8 = vector.extract_strided_slice %0 {offsets = [0, 2, 0], sizes = [8, 7, 16], strides = [1, 1, 1]} : vector<8x9x16xbf16> to vector<8x7x16xbf16>
    %9 = tpu.concatenate %6, %7, %8 in 2 : vector<8x7x16xbf16>, vector<8x7x16xbf16>, vector<8x7x16xbf16> -> vector<8x7x48xbf16>
    %c0_4 = arith.constant 0 : index
    %c0_5 = arith.constant 0 : index
    %10 = vector.load %arg1[%c0_4, %c0_5] : memref<304x128xbf16, #tpu.memory_space<vmem>>, vector<48x128xbf16>
    %cst = arith.constant dense<0.000000e+00> : vector<8x7x128xf32>
    %11 = tpu.matmul %9, %10, %cst {dimension_numbers = #tpu.dot_dimension_numbers<[2], [0], [0, 1], [1], [0, 0, 0, 1, 1, 1], [], []>} : vector<8x7x48xbf16>, vector<48x128xbf16>, vector<8x7x128xf32> -> vector<8x7x128xf32>
    %12 = tpu.iota {dimensions = array<i32: 0>} : vector<7x128xi32>
    %13 = arith.sitofp %12 : vector<7x128xi32> to vector<7x128xf32>
    %14 = vector.broadcast %5 : vector<1x128xf32> to vector<7x128xf32>
    %15 = arith.cmpf ole, %13, %14 : vector<7x128xf32>
    %cst_6 = arith.constant 0.000000e+00 : f32
    %cst_7 = arith.constant -1.000000e+30 : f32
    %16 = vector.broadcast %cst_6 : f32 to vector<7x128xf32>
    %17 = vector.broadcast %cst_7 : f32 to vector<7x128xf32>
    %18 = arith.select %15, %16, %17 : vector<7x128xi1>, vector<7x128xf32>
    %19 = vector.shape_cast %18 : vector<7x128xf32> to vector<1x7x128xf32>
    %20 = vector.broadcast %19 : vector<1x7x128xf32> to vector<8x7x128xf32>
    %21 = arith.addf %11, %20 : vector<8x7x128xf32>
    %cst_8 = arith.constant dense<0xFF800000> : vector<8x128xf32>
    %22 = vector.multi_reduction <maximumf>, %21, %cst_8 [1] : vector<8x7x128xf32> to vector<8x128xf32>
    %23 = vector.broadcast %2 : vector<1x128xf32> to vector<8x128xf32>
    %24 = arith.addf %22, %23 : vector<8x128xf32>
    %cst_9 = arith.constant 0.000000e+00 : f32
    %25 = vector.broadcast %cst_9 : f32 to vector<8x128xf32>
    %26 = arith.maximumf %24, %25 : vector<8x128xf32>
    %c48 = arith.constant 48 : index
    %c0_10 = arith.constant 0 : index
    %27 = vector.load %arg1[%c48, %c0_10] : memref<304x128xbf16, #tpu.memory_space<vmem>>, vector<128x128xbf16>
    %c176 = arith.constant 176 : index
    %c0_11 = arith.constant 0 : index
    %28 = vector.load %arg1[%c176, %c0_11] : memref<304x128xbf16, #tpu.memory_space<vmem>>, vector<128x128xbf16>
    %29 = arith.truncf %26 : vector<8x128xf32> to vector<8x128xbf16>
    %cst_12 = arith.constant dense<0.000000e+00> : vector<8x128xf32>
    %30 = tpu.matmul %29, %27, %cst_12 {dimension_numbers = #tpu.dot_dimension_numbers<[1], [0], [0], [1], [0, 0, 1, 1], [], []>} : vector<8x128xbf16>, vector<128x128xbf16>, vector<8x128xf32> -> vector<8x128xf32>
    %31 = vector.broadcast %3 : vector<1x128xf32> to vector<8x128xf32>
    %32 = arith.addf %30, %31 : vector<8x128xf32>
    %cst_13 = arith.constant 0.000000e+00 : f32
    %33 = vector.broadcast %cst_13 : f32 to vector<8x128xf32>
    %34 = arith.maximumf %32, %33 : vector<8x128xf32>
    %35 = arith.truncf %34 : vector<8x128xf32> to vector<8x128xbf16>
    %cst_14 = arith.constant dense<0.000000e+00> : vector<8x128xf32>
    %36 = tpu.matmul %35, %28, %cst_14 {dimension_numbers = #tpu.dot_dimension_numbers<[1], [0], [0], [1], [0, 0, 1, 1], [], []>} : vector<8x128xbf16>, vector<128x128xbf16>, vector<8x128xf32> -> vector<8x128xf32>
    %37 = vector.broadcast %4 : vector<1x128xf32> to vector<8x128xf32>
    %38 = arith.addf %36, %37 : vector<8x128xf32>
    %c0_15 = arith.constant 0 : index
    %c0_16 = arith.constant 0 : index
    %39 = vector.load %arg3[%c0_15, %c0_16] : memref<8x128xf32, #tpu.memory_space<vmem>>, vector<8x128xf32>
    tpu.vector_store %arg3[%c0_15, %c0_16], %38 {strides = array<i32>} : memref<8x128xf32, #tpu.memory_space<vmem>>, vector<8x128xf32>,
    return
  }
}

</mosaic_0001>

<bundles_post_ra>
// kernel: tpu_custom_call.1
= control target key start
LH: loop header
LB: loop body
LE: loop exit
PB: predicated region body
PF: predicated region fallthrough
CT: control target
= control target key end

     0   :  { %8 = vsyncpa [#allocation3], 0  ;;  %s2805_s0 = inlined_call_operand.vmem [shape: bf16[8,9,16], index: 0, kind: input, shape index: {}]   ;;  %s2806_s1 = inlined_call_operand.hbm [shape: bf16[304,128], index: 1, kind: input, shape index: {}]   ;;  %s2807_s2 = inlined_call_operand.vmem [shape: f32[8,128], index: 2, kind: input, shape index: {}]   ;;  %s2808_s3 = inlined_call_operand.hbm [shape: f32[8,128], index: 3, kind: output, shape index: {}]  }
   0x1   :  { %9 = vsyncpa [#allocation4], 0  ;;  %s2303_s12 = smov [#allocation2]  }
   0x2   :  { %s17_s13 = sshll.u32 %s2303_s12, 4  ;;  %s18_s13 = int_to_ptr.vmem [resolvable:$true] %s17_s13 }
   0x3   :  { %s2267_s14 = scalar_lea.vmem %s18_s13, 2432  ;;  %p2272_p1 = scmp.lt.s32.totalorder %s18_s13, %s18_s13 }
   0x4   :  { %p2268_p0 = scmp.ne.s32.totalorder %s18_s13, %s2267_s14  ;;  %p2273_p2 = scmp.lt.s32.totalorder %s2267_s14, %s2267_s14 }
   0x6   :  { %p2274_p3 = por %p2273_p2, %p2272_p1 }
   0x8   :  { %p2275_p4 = pnand %p2274_p3, %p2268_p0 }
   0xa   :  { %2278 = shalt.err (!%p2275_p4)
}
   0xb   :  { %s2304_s15 = smov 64   ;;  %s2305_s16 = smov 4  }
   0xc   :  { %23 = dma.hbm_to_vmem [thread:$0]  %s2806_s1, 2432, %s18_s13, [#allocation3], %s2304_s15, %s2304_s15, %s2305_s16  }
   0xd   :  { %2299 = dma.done.wait [#allocation3], 2432  }
   0xe   :  { %2300 = vsyncadd [#allocation3], 4294964864  ;;  %v2339_v0 = vld [vmem:[%s2805_s0 + $0x8] sm:$0xf]  ;;  %v33_v1 = vld [vmem:[%s2805_s0 + $0xc] sm:$0x1] }
   0xf   :  { %v2347_v2 = vld [vmem:[%s2805_s0] sm:$0xf]  ;;  %v2082_v3 = vcombine.low %v2339_v0, %v33_v1  ;;  %v2074_v4 = vcombine.low %v2339_v0, %v2339_v0  ;;  %v31_v5 = vld [vmem:[%s2805_s0 + $0x4] sm:$0x1]  ;;  %v2360_v7 = vld [vmem:[%s2805_s0 + $0x18] sm:$0xf] }
  0x10   :  { %v2073_v6 = vcombine.low %v2347_v2, %v2347_v2  ;;  %v37_v8 = vld [vmem:[%s2805_s0 + $0x1c] sm:$0x1]  ;;  %v2081_v9 = vcombine.low %v2347_v2, %v31_v5  ;;  %v2370_v11 = vld [vmem:[%s2805_s0 + $0x10] sm:$0xf]  ;;  %v35_v12 = vld [vmem:[%s2805_s0 + $0x14] sm:$0x1]  ;;  %v2076_v23 = vcombine.low %v2360_v7, %v2360_v7 }
  0x11   :  { %v2084_v10 = vcombine.low %v2360_v7, %v37_v8  ;;  %v2378_v13 = vld [vmem:[%s2805_s0 + $0x20] sm:$0xf]  ;;  %v168_v14 = vrot.slane %v2082_v3, 1  ;;  %v2083_v15 = vcombine.low %v2370_v11, %v35_v12  ;;  %v39_v16 = vld [vmem:[%s2805_s0 + $0x24] sm:$0x1]  ;;  %v2075_v20 = vcombine.low %v2370_v11, %v2370_v11  ;;  %s2306_s11 = smov 32  }
  0x12   :  { %v74_v17 = vshll.u32 %v2073_v6, 16  ;;  %v167_v18 = vrot.slane %v2081_v9, 1  ;;  %v2085_v19 = vcombine.low %v2378_v13, %v39_v16  ;;  %v81_v22 = vshll.u32 %v2074_v4, 16  ;;  %v2393_v24 = vld [vmem:[%s2805_s0 + $0x28] sm:$0xf]  ;;  %s2307_s20 = smov 16  }
  0x13   :  { %177 = vrot.lane.b32.xlu1 %v168_v14, %s2306_s11  ;;  %v170_v21 = vrot.slane %v2084_v10, 1  ;;  %v2398_v25 = vld [vmem:[%s2805_s0 + $0x38] sm:$0xf]  ;;  %v169_v26 = vrot.slane %v2083_v15, 1  ;;  %v72_v27 = vshrl.u32 %v2073_v6, 16  ;;  %v88_v29 = vshll.u32 %v2075_v20, 16 }
  0x14   :  { %175 = vrot.lane.b32.xlu0 %v167_v18, %s2306_s11  ;;  %v76_v28 = vrot.slane %v74_v17, 1  ;;  %v171_v30 = vrot.slane %v2085_v19, 1  ;;  %v79_v31 = vshrl.u32 %v2074_v4, 16  ;;  %v2077_v32 = vcombine.low %v2378_v13, %v2378_v13  ;;  %v41_v33 = vld [vmem:[%s2805_s0 + $0x2c] sm:$0x1]  ;;  %v2240_v1 = vld [vmem:[#allocation2 + $0x10] sm:$0xff]  }
  0x15   :  { %v2078_v34 = vcombine.low %v2393_v24, %v2393_v24  ;;  %v2080_v35 = vcombine.low %v2398_v25, %v2398_v25  ;;  %v2413_v36 = vld [vmem:[%s2805_s0 + $0x30] sm:$0xf]  ;;  %v86_v37 = vshrl.u32 %v2075_v20, 16  ;;  %v90_v38 = vrot.slane %v88_v29, 1  ;;  %v45_v63 = vld [vmem:[%s2805_s0 + $0x3c] sm:$0x1]  ;;  %2160 = vmatprep.subr.bf16.mxu0 %v2240_v1 }
  0x16   :  { %v83_v39 = vrot.slane %v81_v22, 1  ;;  %v95_v40 = vshll.u32 %v2076_v23, 16  ;;  %v77_v41 = vor.u32 %v76_v28, %v72_v27  ;;  %v102_v42 = vshll.u32 %v2077_v32, 16  ;;  %v43_v3 = vld [vmem:[%s2805_s0 + $0x34] sm:$0x1]  ;;  %2161 = vmatpush3.bf16.msra.mxu0 %v2240_v1  ;;  %v2241_v5 = vld [vmem:[#allocation2 + $0x8] sm:$0xff]  }
  0x17   :  { %181 = vrot.lane.b32.xlu1 %v170_v21, %s2306_s11  ;;  %v2086_v43 = vcombine.low %v2393_v24, %v41_v33  ;;  %v109_v44 = vshll.u32 %v2078_v34, 16  ;;  %v123_v45 = vshll.u32 %v2080_v35, 16  ;;  %v93_v46 = vshrl.u32 %v2076_v23, 16  ;;  %2162 = vmatprep.subr.bf16.mxu0 %v2241_v5  ;;  %v2242_v12 = vld [vmem:[#allocation2] sm:$0xff]  }
  0x18   :  { %179 = vrot.lane.b32.xlu0 %v169_v26, %s2306_s11  ;;  %v2079_v47 = vcombine.low %v2413_v36, %v2413_v36  ;;  %v91_v48 = vor.u32 %v90_v38, %v86_v37  ;;  %v84_v49 = vor.u32 %v83_v39, %v79_v31  ;;  %v97_v50 = vrot.slane %v95_v40, 1 }
  0x19   :  { %v100_v51 = vshrl.u32 %v2077_v32, 16  ;;  %v104_v52 = vrot.slane %v102_v42, 1  ;;  %v172_v53 = vrot.slane %v2086_v43, 1  ;;  %v107_v54 = vshrl.u32 %v2078_v34, 16 }
  0x1a   :  { %v121_v55 = vshrl.u32 %v2080_v35, 16  ;;  %v111_v56 = vrot.slane %v109_v44, 1  ;;  %v125_v57 = vrot.slane %v123_v45, 1  ;;  %v114_v58 = vshrl.u32 %v2079_v47, 16  ;;  %2163 = vmatpush3.bf16.msra.mxu0 %v2241_v5 }
  0x1b   :  { %183 = vrot.lane.b32.xlu1 %v171_v30, %s2306_s11  ;;  %v116_v59 = vshll.u32 %v2079_v47, 16  ;;  %v98_v60 = vor.u32 %v97_v50, %v93_v46  ;;  %v105_v61 = vor.u32 %v104_v52, %v100_v51  ;;  %v2088_v8 = vcombine.low %v2398_v25, %v45_v63  ;;  %2164 = vmatprep.subr.bf16.mxu0 %v2242_v12 }
  0x1c   :  { %127 = vrot.lane.b32.xlu0 %v77_v41, %s2307_s20  ;;  %v112_v4 = vor.u32 %v111_v56, %v107_v54  ;;  %v126_v6 = vor.u32 %v125_v57, %v121_v55  ;;  %v2087_v10 = vcombine.low %v2413_v36, %v43_v3  ;;  %v239_v17 = vlaneseq }
  0x1d   :  { %v118_v62 = vrot.slane %v116_v59, 1  ;;  %v174_v14 = vrot.slane %v2088_v8, 1  ;;  %v2308_v18 = vmov 1966171168   ;;  %vm191_vm0 = vcmask 130048  }
  0x1e   :  { %v173_v15 = vrot.slane %v2087_v10, 1  ;;  %2165 = vmatpush3.bf16.msra.mxu0 %v2242_v12  ;;  %v257_v19 = vunpack.c.l.s4 %v2308_v18  ;;  %v2440_v22 = vshrl.u32 %v239_v17, 7  ;;  %vm216_vm1 = vcmask 261120  }
  0x1f   :  { %131 = vrot.lane.b32.xlu1 %v91_v48, %s2307_s20  ;;  %v119_v9 = vor.u32 %v118_v62, %v114_v58  ;;  %vm896_vm2 = vcmask 392192   ;;  %vm2310_vm3 = vmmov 0   ;;  %vm1715_vm5 = vcmask 1046528  }
  0x20   :  { %129 = vrot.lane.b32.xlu0 %v84_v49, %s2307_s20  ;;  %v258_v23 = vunpack.c.0.s8 %v257_v19  ;;  %vm1853_vm6 = vcmask 1041409   ;;  %vm1856_vm7 = vcmask 1042434   ;;  %vm1859_vm8 = vcmask 1043459  }
  0x21   :  { %vm1862_vm9 = vcmask 1044484   ;;  %vm1865_vm10 = vcmask 1045509   ;;  %vm1868_vm11 = vcmask 1046534   ;;  %vm1871_vm12 = vcmask 1047559  }
  0x22   :  { %v2443_v28 = vsub.s32 %v258_v23, %v2440_v22 }
  0x23   :  { %133 = vrot.lane.b32.xlu1 %v98_v60, %s2307_s20 }
  0x24   :  { %135 = vrot.lane.b32.xlu0 %v105_v61, %s2307_s20 }
  0x27   :  { %185 = vrot.lane.b32.xlu1 %v172_v53, %s2306_s11 }
  0x28   :  { %137 = vrot.lane.b32.xlu0 %v112_v4, %s2307_s20 }
  0x2b   :  { %141 = vrot.lane.b32.xlu1 %v126_v6, %s2307_s20 }
  0x2c   :  { %139 = vrot.lane.b32.xlu0 %v119_v9, %s2307_s20 }
  0x2f   :  { %189 = vrot.lane.b32.xlu1 %v174_v14, %s2306_s11 }
  0x30   :  { %187 = vrot.lane.b32.xlu0 %v173_v15, %s2306_s11 }
  0x85   :  { %v178_v16 = vpop.permute.xlu1 %177 }
  0x86   :  { %v176_v20 = vpop.permute.xlu0 %175 }
  0x89   :  { %v182_v21 = vpop.permute.xlu1 %181 }
  0x8a   :  { %v180_v26 = vpop.permute.xlu0 %179 }
  0x8d   :  { %v184_v27 = vpop.permute.xlu1 %183 }
  0x8e   :  { %v128_v29 = vpop.permute.xlu0 %127 }
  0x8f   :  { %v194_v30 = vsel %vm191_vm0, %v2347_v2, %v128_v29 }
  0x90   :  { %v218_v31 = vsel %vm216_vm1, %v194_v30, %v176_v20 }
  0x91   :  { %v262_v32 = vrot.slane %v218_v31, %v2443_v28  ;;  %v132_v33 = vpop.permute.xlu1 %131 }
  0x92   :  { %v200_v34 = vsel %vm191_vm0, %v2370_v11, %v132_v33  ;;  %v130_v35 = vpop.permute.xlu0 %129 }
  0x93   :  { %v263_v37 = vcombine.high %v262_v32, %v262_v32  ;;  %v2452_v38 = vrot.slane %v262_v32, %v2443_v28  ;;  %v222_v39 = vsel %vm216_vm1, %v200_v34, %v180_v26  ;;  %v197_v40 = vsel %vm191_vm0, %v2339_v0, %v130_v35 }
  0x94   :  { %v310_v2 = vrot.slane %v222_v39, %v2443_v28  ;;  %v220_v41 = vsel %vm216_vm1, %v197_v40, %v178_v16 }
  0x95   :  { %v2460_v42 = vrot.slane %v263_v37, %v2443_v28  ;;  %v286_v43 = vrot.slane %v220_v41, %v2443_v28  ;;  %v134_v11 = vpop.permute.xlu1 %133  ;;  %v278_v0 = vcombine.high %v2452_v38, %v2452_v38 }
  0x96   :  { %v311_v44 = vcombine.high %v310_v2, %v310_v2  ;;  %v2464_v45 = vrot.slane %v310_v2, %v2443_v28  ;;  %v203_v46 = vsel %vm191_vm0, %v2360_v7, %v134_v11  ;;  %v136_v47 = vpop.permute.xlu0 %135 }
  0x97   :  { %v279_v48 = vcombine.high %v2460_v42, %v2460_v42  ;;  %v287_v49 = vcombine.high %v286_v43, %v286_v43  ;;  %v2473_v50 = vrot.slane %v286_v43, %v2443_v28  ;;  %v224_v53 = vsel %vm216_vm1, %v203_v46, %v182_v21 }
  0x98   :  { %v325_v51 = vrot.slane %v311_v44, %v2443_v28  ;;  %v326_v52 = vcombine.high %v2464_v45, %v2464_v45  ;;  %v206_v7 = vsel %vm191_vm0, %v2378_v13, %v136_v47  ;;  %v581_v54 = vcombine.low %v2452_v38, %v2460_v42 }
  0x99   :  { %v2484_v55 = vrot.slane %v287_v49, %v2443_v28  ;;  %v2488_v56 = vcombine.high %v2473_v50, %v2473_v50  ;;  %v334_v57 = vrot.slane %v224_v53, %v2443_v28  ;;  %v186_v58 = vpop.permute.xlu1 %185  ;;  %v456_v61 = vunpack.i.h.s16 %v2473_v50 }
  0x9a   :  { %v327_v59 = vcombine.high %v325_v51, %v325_v51  ;;  %v2491_v60 = vcombine.low %v325_v51, %v326_v52  ;;  %v226_v13 = vsel %vm216_vm1, %v206_v7, %v184_v27  ;;  %v138_v62 = vpop.permute.xlu0 %137  ;;  %v2505_v9 = vpack.i.b16 %v2473_v50, %v279_v48 }
  0x9b   :  { %v335_v63 = vcombine.high %v334_v57, %v334_v57  ;;  %v342_v1 = vrot.slane %v334_v57, %v2443_v28  ;;  %v358_v3 = vrot.slane %v226_v13, %v2443_v28  ;;  %v209_v4 = vsel %vm191_vm0, %v2393_v24, %v138_v62 }
  0x9c   :  { %v640_v5 = vrot.slane %v2491_v60, %v2443_v28  ;;  %v228_v6 = vsel %vm216_vm1, %v209_v4, %v186_v58  ;;  %v303_v8 = vcombine.high %v2484_v55, %v2484_v55  ;;  %v458_v16 = vunpack.i.h.s16 %v2484_v55 }
  0x9d   :  { %v349_v10 = vrot.slane %v335_v63, %v2443_v28  ;;  %v350_v12 = vcombine.high %v342_v1, %v342_v1  ;;  %v470_v14 = vunpack.i.h.s16 %v342_v1  ;;  %v142_v15 = vpop.permute.xlu1 %141  ;;  %v2509_v17 = vpack.i.b16 %v342_v1, %v327_v59 }
  0x9e   :  { %v359_v24 = vcombine.high %v358_v3, %v358_v3  ;;  %v2512_v18 = vrot.slane %v358_v3, %v2443_v28  ;;  %v382_v19 = vrot.slane %v228_v6, %v2443_v28  ;;  %v140_v20 = vpop.permute.xlu0 %139  ;;  %v215_v32 = vsel %vm191_vm0, %v2398_v25, %v142_v15 }
  0x9f   :  { %v351_v21 = vcombine.high %v349_v10, %v349_v10  ;;  %v472_v23 = vunpack.i.h.s16 %v349_v10  ;;  %v474_v26 = vunpack.i.h.s16 %v350_v12  ;;  %v2515_v27 = vpack.i.b16 %v349_v10, %v470_v14 }
  0xa0   :  { %v2518_v29 = vrot.slane %v359_v24, %v2443_v28  ;;  %v383_v30 = vcombine.high %v382_v19, %v382_v19  ;;  %v390_v31 = vrot.slane %v382_v19, %v2443_v28  ;;  %v374_v37 = vcombine.high %v2512_v18, %v2512_v18 }
  0xa1   :  { %v2523_v33 = vpack.i.b16 %v350_v12, %v472_v23  ;;  %v2525_v34 = vpack.i.b16 %v351_v21, %v474_v26  ;;  %v631_v35 = vcombine.low %v2509_v17, %v2515_v27  ;;  %v190_v39 = vpop.permute.xlu1 %189  ;;  %v212_v25 = vsel %vm191_vm0, %v2413_v36, %v140_v20 }
  0xa2   :  { %v375_v40 = vcombine.high %v2518_v29, %v2518_v29  ;;  %v397_v2 = vrot.slane %v383_v30, %v2443_v28  ;;  %v398_v41 = vcombine.high %v390_v31, %v390_v31  ;;  %v188_v43 = vpop.permute.xlu0 %187  ;;  %v633_v11 = vcombine.low %v2512_v18, %v2518_v29 }
  0xa3   :  { %v484_v44 = vunpack.i.h.s16 %v390_v31  ;;  %v232_v46 = vsel %vm216_vm1, %v215_v32, %v190_v39  ;;  %v230_v47 = vsel %vm216_vm1, %v212_v25, %v188_v43  ;;  %v460_v51 = vunpack.i.h.s16 %v2488_v56 }
  0xa4   :  { %v486_v48 = vunpack.i.h.s16 %v397_v2  ;;  %v2097_v49 = vpack.i.b16 %v390_v31, %v375_v40  ;;  %v430_v50 = vrot.slane %v232_v46, %v2443_v28  ;;  %v399_v53 = vcombine.high %v397_v2, %v397_v2 }
  0xa5   :  { %v2098_v52 = vpack.i.b16 %v397_v2, %v484_v44  ;;  %v488_v7 = vunpack.i.h.s16 %v398_v41  ;;  %v406_v36 = vrot.slane %v230_v47, %v2443_v28  ;;  %v2090_v3 = vpack.i.b16 %v2484_v55, %v456_v61 }
  0xa6   :  { %v2099_v57 = vpack.i.b16 %v398_v41, %v486_v48  ;;  %v679_v58 = vcombine.low %v374_v37, %v2097_v49  ;;  %v431_v59 = vcombine.high %v430_v50, %v430_v50  ;;  %v438_v13 = vrot.slane %v430_v50, %v2443_v28 }
  0xa7   :  { %v2100_v62 = vpack.i.b16 %v399_v53, %v488_v7  ;;  %v407_v63 = vcombine.high %v406_v36, %v406_v36  ;;  %v414_v1 = vrot.slane %v406_v36, %v2443_v28  ;;  %v2091_v12 = vpack.i.b16 %v2488_v56, %v458_v16 }
  0xa8   :  { %v445_v4 = vrot.slane %v431_v59, %v2443_v28  ;;  %v446_v6 = vcombine.high %v438_v13, %v438_v13  ;;  %v498_v10 = vunpack.i.h.s16 %v438_v13  ;;  %v2092_v24 = vpack.i.b16 %v303_v8, %v460_v51  ;;  %v2244_v59 = vld [vmem:[#allocation2 + $0x48] sm:$0xff]  }
  0xa9   :  { %v421_v14 = vrot.slane %v407_v63, %v2443_v28  ;;  %v422_v15 = vcombine.high %v414_v1, %v414_v1  ;;  %v681_v17 = vcombine.low %v2100_v62, %v414_v1  ;;  %v582_v55 = vcombine.low %v278_v0, %v2505_v9  ;;  %v2246_v62 = vld [vmem:[#allocation2 + $0x38] sm:$0xff]   ;;  %v2247_v63 = vld [vmem:[#allocation2 + $0x30] sm:$0xff]   ;;  %v2248_v1 = vld [vmem:[#allocation2 + $0x28] sm:$0xff]  }
  0xaa   :  { %v447_v18 = vcombine.high %v445_v4, %v445_v4  ;;  %v500_v19 = vunpack.i.h.s16 %v445_v4  ;;  %v502_v20 = vunpack.i.h.s16 %v446_v6  ;;  %v2102_v21 = vpack.i.b16 %v445_v4, %v498_v10  ;;  %v2599_v4 = vld [vmem:[%s2807_s2] sm:$0xff]  ;;  %s2312_s2 = smov [#allocation5]  }
  0xab   :  { %v423_v23 = vcombine.high %v421_v14, %v421_v14  ;;  %v682_v26 = vcombine.low %v421_v14, %v422_v15  ;;  %v703_v27 = vrot.slane %v681_v17, %v2443_v28  ;;  %v583_v16 = vcombine.low %v2090_v3, %v2091_v12  ;;  %v2250_v14 = vld [vmem:[#allocation2 + $0x18] sm:$0xff]   ;;  %s2064_s25 = sshll.u32 %s2312_s2, 4  ;;  %s2065_s25 = int_to_ptr.vmem [resolvable:$true] %s2064_s25 }
  0xac   :  { %v2103_v61 = vpack.i.b16 %v446_v6, %v500_v19  ;;  %v2104_v56 = vpack.i.b16 %v447_v18, %v502_v20  ;;  %v584_v29 = vcombine.low %v2092_v24, %v2464_v45  ;;  %v591_v31 = vrot.slane %v581_v54, %v2443_v28  ;;  %v2249_v6 = vld [vmem:[#allocation2 + $0x20] sm:$0xff]   ;;  %v2251_v24 = vld [vmem:[#allocation2 + $0x90] sm:$0xff]   ;;  %v2252_v19 = vld [vmem:[#allocation2 + $0x88] sm:$0xff]   ;;  %s2279_s26 = scalar_lea.vmem %s2065_s25, 128  ;;  %p2284_p6 = scmp.lt.s32.totalorder %s2065_s25, %s2065_s25 }
  0xad   :  { %v2101_v30 = vpack.i.b16 %v438_v13, %v423_v23  ;;  %v710_v8 = vrot.slane %v682_v26, %v2443_v28  ;;  %v598_v32 = vrot.slane %v582_v55, %v2443_v28  ;;  %v605_v39 = vrot.slane %v583_v16, %v2443_v28  ;;  %v2245_v13 = vld [vmem:[#allocation2 + $0x40] sm:$0xff]   ;;  %p2280_p5 = scmp.ne.s32.totalorder %s2065_s25, %s2279_s26  ;;  %p2285_p7 = scmp.lt.s32.totalorder %s2279_s26, %s2279_s26 }
  0xae   :  { %v729_v37 = vcombine.low %v2103_v61, %v2104_v56  ;;  %v612_v0 = vrot.slane %v584_v29, %v2443_v28  ;;  %v632_v9 = vcombine.low %v2523_v33, %v2525_v34  ;;  %v647_v41 = vrot.slane %v631_v35, %v2443_v28  ;;  %v2253_v23 = vld [vmem:[#allocation2 + $0x80] sm:$0xff]   ;;  %v2254_v56 = vld [vmem:[#allocation2 + $0x78] sm:$0xff]  }
  0xaf   :  { %v712_v40 = vcombine.low %v703_v27, %v710_v8  ;;  %v728_v45 = vcombine.low %v2101_v30, %v2102_v21  ;;  %v613_v2 = vcombine.low %v591_v31, %v598_v32  ;;  %v661_v25 = vrot.slane %v633_v11, %v2443_v28  ;;  %v2255_v31 = vld [vmem:[#allocation2 + $0x70] sm:$0xff]   ;;  %p2286_p8 = por %p2285_p7, %p2284_p6 }
  0xb0   :  { %v614_v43 = vcombine.low %v605_v39, %v612_v0  ;;  %v654_v38 = vrot.slane %v632_v9, %v2443_v28  ;;  %v680_v42 = vcombine.low %v2098_v52, %v2099_v57  ;;  %v662_v54 = vcombine.low %v640_v5, %v647_v41  ;;  %v2243_v57 = vld [vmem:[#allocation2 + $0x50] sm:$0xff]   ;;  %v2256_v9 = vld [vmem:[#allocation2 + $0x68] sm:$0xff]  }
  0xb1   :  { %v689_v44 = vrot.slane %v679_v58, %v2443_v28  ;;  %v621_v46 = vrot.slane %v613_v2, %v2443_v28  ;;  %v726_v35 = vrot.slane %v712_v40, %v2443_v28  ;;  %v736_v11 = vrot.slane %v728_v45, %v2443_v28  ;;  %p2287_p9 = pnand %p2286_p8, %p2280_p5 }
  0xb2   :  { %v628_v33 = vrot.slane %v614_v43, %v2443_v28  ;;  %v663_v34 = vcombine.low %v654_v38, %v661_v25  ;;  %v696_v47 = vrot.slane %v680_v42, %v2443_v28  ;;  %v743_v48 = vrot.slane %v729_v37, %v2443_v28 }
  0xb3   :  { %v670_v60 = vrot.slane %v662_v54, %v2443_v28  ;;  %v2309_v58 = vmov 0.0   ;;  %v244_v3 = vsub.s32 3, %v2440_v22  ;;  %v241_v10 = vcvt.s32.f32 %v2440_v22 }
  0xb4   :  { %v629_v49 = vcombine.low %v621_v46, %v628_v33  ;;  %v677_v5 = vrot.slane %v663_v34, %v2443_v28  ;;  %v711_v50 = vcombine.low %v689_v44, %v696_v47  ;;  %v744_v7 = vcombine.low %v736_v11, %v743_v48  ;;  %2174 = vmatprep.subr.bf16.mxu1 %v2309_v58 }
  0xb5   :  { %2194 = vmatprep.subr.bf16.mxu0 %v2309_v58  ;;  %2175 = vmatpush3.bf16.msra.mxu1 %v2243_v57  ;;  %v245_v12 = vrot.slane %v2599_v4, %v244_v3  ;;  %v2311_v15 = vmov -1e+30   ;;  %v1774_v3 = vsub.s32 0, %v2440_v22 }
  0xb6   :  { %2166 = vmatprep.mubr.msk.bf16.mxu0 %vm896_vm2, %v629_v49  ;;  %v678_v51 = vcombine.low %v670_v60, %v677_v5  ;;  %v719_v52 = vrot.slane %v711_v50, %v2443_v28  ;;  %v751_v36 = vrot.slane %v744_v7, %v2443_v28  ;;  %2176 = vmatprep.subr.bf16.mxu1 %v2309_v58 }
  0xb7   :  { %2190 = vmatprep.mubr.msk.bf16.mxu1 %vm2310_vm3, %v2309_v58  ;;  %vm246_vm4 = vcmp.le.f32.partialorder %v241_v10, %v245_v12 }
  0xb8   :  { %2167 = vmatmul.mubr.msk.bf16.vlgmr.msra.gmra.mxu0 %vm896_vm2, %v678_v51  ;;  %v727_v53 = vcombine.low %v719_v52, %v726_v35  ;;  %v247_v17 = vsel %vm246_vm4, 0.0, %v2311_v15 }
  0xb9   :  { %2177 = vmatpush3.bf16.msra.mxu1 %v2244_v59  ;;  %v505_v18 = vcombine.high %v247_v17, %v247_v17  ;;  %2195 = vmatpush3.bf16.msra.mxu0 %v2251_v24  ;;  %v512_v20 = vrot.slane %v247_v17, %v2443_v28 }
  0xba   :  { %2170 = vmatprep.mubr.msk.bf16.mxu0 %vm896_vm2, %v727_v53  ;;  %2178 = vmatprep.subr.bf16.mxu1 %v2309_v58 }
  0xbb   :  { %2196 = vmatprep.subr.bf16.mxu0 %v2309_v58  ;;  %v519_v21 = vrot.slane %v505_v18, %v2443_v28  ;;  %v520_v26 = vcombine.high %v512_v20, %v512_v20  ;;  %v528_v55 = vrot.slane %v512_v20, %v2443_v28 }
  0xbd   :  { %2179 = vmatpush3.bf16.msra.mxu1 %v2245_v13  ;;  %2197 = vmatpush3.bf16.msra.mxu0 %v2252_v19  ;;  %v521_v27 = vcombine.high %v519_v21, %v519_v21  ;;  %v535_v61 = vrot.slane %v519_v21, %v2443_v28  ;;  %v542_v16 = vrot.slane %v520_v26, %v2443_v28 }
  0xbe   :  { %2180 = vmatprep.subr.bf16.mxu1 %v2309_v58  ;;  %2198 = vmatprep.subr.bf16.mxu0 %v2309_v58  ;;  %v550_v30 = vcombine.high %v528_v55, %v528_v55 }
  0xbf   :  { %v549_v29 = vrot.slane %v521_v27, %v2443_v28  ;;  %v551_v8 = vcombine.high %v535_v61, %v535_v61  ;;  %v2108_v32 = vcombine.high %v528_v55, %v542_v16  ;;  %v552_v40 = vcombine.high %v542_v16, %v542_v16 }
  0xc0   :  { %2171 = vmatmul.mubr.msk.bf16.gmra.mxu0 %vm896_vm2, %v751_v36  ;;  %v819_v0 = vcombine.low %v542_v16, %v550_v30  ;;  %v770_v45 = vcombine.low %v528_v55, %v542_v16  ;;  %v2657_v27 = vrot.slane %v2599_v4, %v1774_v3 }
  0xc1   :  { %2210 = vmatprep.mubr.msk.bf16.mxu0 %vm2310_vm3, %v2309_v58  ;;  %2181 = vmatpush3.bf16.msra.mxu1 %v2246_v62  ;;  %v772_v37 = vcombine.low %v535_v61, %v549_v29  ;;  %v773_v39 = vcombine.low %v551_v8, %v528_v55  ;;  %v787_v2 = vrot.slane %v2108_v32, %v2443_v28 }
  0xc2   :  { %2182 = vmatprep.subr.bf16.mxu1 %v2309_v58  ;;  %2199 = vmatpush3.bf16.msra.mxu0 %v2253_v23  ;;  %v828_v43 = vrot.slane %v819_v0, %v2443_v28  ;;  %v820_v38 = vcombine.low %v552_v40, %v535_v61  ;;  %v821_v42 = vcombine.low %v549_v29, %v551_v8 }
  0xc3   :  { %2200 = vmatprep.subr.bf16.mxu0 %v2309_v58  ;;  %v794_v41 = vrot.slane %v772_v37, %v2443_v28  ;;  %v801_v25 = vrot.slane %v773_v39, %v2443_v28  ;;  %v780_v54 = vrot.slane %v770_v45, %v2443_v28 }
  0xc4   :  { %v835_v33 = vrot.slane %v820_v38, %v2443_v28  ;;  %v842_v34 = vrot.slane %v821_v42, %v2443_v28 }
  0xc5   :  { %2183 = vmatpush3.bf16.msra.mxu1 %v2247_v63  ;;  %v860_v44 = vcombine.low %v787_v2, %v794_v41  ;;  %v861_v46 = vcombine.low %v801_v25, %v828_v43  ;;  %v802_v47 = vcombine.low %v780_v54, %v787_v2  ;;  %v803_v35 = vcombine.low %v794_v41, %v801_v25 }
  0xc6   :  { %2184 = vmatprep.subr.bf16.mxu1 %v2309_v58  ;;  %2201 = vmatpush3.bf16.msra.mxu0 %v2254_v56  ;;  %v877_v49 = vcombine.low %v835_v33, %v842_v34  ;;  %v843_v7 = vcombine.low %v828_v43, %v835_v33  ;;  %v844_v36 = vcombine.low %v842_v34, %v780_v54 }
  0xc7   :  { %2202 = vmatprep.subr.bf16.mxu0 %v2309_v58  ;;  %v2625_v11 = vrot.slane %v860_v44, %v2443_v28  ;;  %v2628_v48 = vrot.slane %v861_v46, %v2443_v28  ;;  %v810_v60 = vrot.slane %v802_v47, %v2443_v28  ;;  %v2632_v5 = vrot.slane %v803_v35, %v2443_v28 }
  0xc8   :  { %v2637_v51 = vrot.slane %v877_v49, %v2443_v28  ;;  %v2644_v10 = vrot.slane %v843_v7, %v2443_v28  ;;  %v2647_v12 = vrot.slane %v844_v36, %v2443_v28 }
  0xc9   :  { %2185 = vmatpush3.bf16.msra.mxu1 %v2248_v1  ;;  %v876_v50 = vcombine.low %v2625_v11, %v2628_v48  ;;  %v818_v52 = vcombine.low %v810_v60, %v2632_v5 }
  0xca   :  { %2186 = vmatprep.subr.bf16.mxu1 %v2309_v58  ;;  %2203 = vmatpush3.bf16.msra.mxu0 %v2255_v31  ;;  %v885_v13 = vcombine.low %v2637_v51, %v810_v60  ;;  %v859_v61 = vcombine.low %v2644_v10, %v2647_v12  ;;  %v888_v45 = vcombine.low %v2628_v48, %v2637_v51 }
  0xcb   :  { %2204 = vmatprep.subr.bf16.mxu0 %v2309_v58  ;;  %v886_v2 = vcombine.low %v2632_v5, %v2644_v10 }
  0xcd   :  { %2187 = vmatpush3.bf16.msra.mxu1 %v2249_v6 }
  0xce   :  { %2188 = vmatprep.subr.bf16.mxu1 %v2309_v58  ;;  %2205 = vmatpush3.bf16.msra.mxu0 %v2256_v9 }
  0xcf   :  { %2206 = vmatprep.subr.bf16.mxu0 %v2309_v58 }
  0xd1   :  { %2189 = vmatpush3.bf16.msra.mxu1 %v2250_v14 }
 0x178   :  { %v2168_v53 = vpop.f32.mrf.mxu0 }
 0x179   :  { %v952_v57 = vadd.f32 %v2168_v53, %v876_v50 }
 0x17a   :  { %v943_v59 = vpop.f32.mrf.mxu0 }
 0x17b   :  { %v1078_v62 = vcombine.high %v952_v57, %v952_v57  ;;  %v1085_v63 = vrot.slane %v952_v57, %v2443_v28  ;;  %v944_v1 = vadd.f32 %v943_v59, %v818_v52 }
 0x17c   :  { %v2169_v6 = vpop.f32.mrf.mxu0 }
 0x17d   :  { %v1092_v14 = vrot.slane %v1078_v62, %v2443_v28  ;;  %v1093_v15 = vcombine.high %v1085_v63, %v1085_v63  ;;  %v980_v17 = vcombine.high %v944_v1, %v944_v1  ;;  %v987_v24 = vrot.slane %v944_v1, %v2443_v28 }
 0x17e   :  { %v955_v18 = vadd.f32 %v2169_v6, %v885_v13  ;;  %v946_v19 = vpop.f32.mrf.mxu0  ;;  %v1101_v9 = vrot.slane %v1085_v63, %v2443_v28 }
 0x17f   :  { %v1094_v20 = vcombine.high %v1092_v14, %v1092_v14  ;;  %v2652_v21 = vrot.slane %v1092_v14, %v2443_v28  ;;  %v994_v23 = vrot.slane %v980_v17, %v2443_v28  ;;  %v1115_v26 = vrot.slane %v1093_v15, %v2443_v28 }
 0x180   :  { %v995_v55 = vcombine.high %v987_v24, %v987_v24  ;;  %v2172_v56 = vpop.f32.mrf.mxu0  ;;  %v1003_v29 = vrot.slane %v987_v24, %v2443_v28  ;;  %v1127_v30 = vcombine.high %v955_v18, %v955_v18  ;;  %v1134_v8 = vrot.slane %v955_v18, %v2443_v28 }
 0x181   :  { %v1122_v16 = vrot.slane %v1094_v20, %v2443_v28  ;;  %v1124_v31 = vcombine.high %v2652_v21, %v2652_v21  ;;  %v996_v32 = vcombine.high %v994_v23, %v994_v23  ;;  %v1010_v37 = vrot.slane %v994_v23, %v2443_v28 }
 0x182   :  { %v1017_v39 = vrot.slane %v995_v55, %v2443_v28  ;;  %v2668_v0 = vpop.f32.mrf.mxu0  ;;  %v1420_v54 = vcombine.low %v1101_v9, %v1115_v26  ;;  %v1141_v44 = vrot.slane %v1127_v30, %v2443_v28  ;;  %v1142_v46 = vcombine.high %v1134_v8, %v1134_v8 }
 0x183   :  { %v1126_v40 = vcombine.high %v1122_v16, %v1122_v16  ;;  %v1024_v41 = vrot.slane %v996_v32, %v2443_v28  ;;  %v1026_v25 = vcombine.high %v1010_v37, %v1010_v37  ;;  %v1150_v33 = vrot.slane %v1134_v8, %v2443_v28 }
 0x184   :  { %v1323_v43 = vcombine.low %v1003_v29, %v1017_v39  ;;  %v2113_v38 = vcombine.high %v1003_v29, %v1017_v39  ;;  %v2173_v42 = vpop.f32.mrf.mxu0  ;;  %v1467_v34 = vcombine.low %v1122_v16, %v1124_v31  ;;  %v2115_v49 = vcombine.high %v1101_v9, %v1115_v26 }
 0x185   :  { %v1325_v47 = vcombine.low %v1010_v37, %v1024_v41  ;;  %v1353_v60 = vrot.slane %v1026_v25, %v2443_v28  ;;  %v1143_v50 = vcombine.high %v1141_v44, %v1141_v44  ;;  %v1164_v51 = vrot.slane %v1142_v46, %v2443_v28 }
 0x186   :  { %v1332_v35 = vrot.slane %v1323_v43, %v2443_v28  ;;  %v1339_v48 = vrot.slane %v2113_v38, %v2443_v28  ;;  %v1172_v7 = vcombine.high %v1150_v33, %v1150_v33  ;;  %v1468_v36 = vcombine.low %v1126_v40, %v1150_v33 }
 0x187   :  { %v1346_v52 = vrot.slane %v1325_v47, %v2443_v28  ;;  %v2684_v57 = vrot.slane %v1420_v54, %v2443_v28  ;;  %v1449_v59 = vrot.slane %v2652_v21, %v2443_v28  ;;  %v1174_v13 = vcombine.high %v1164_v51, %v1164_v51 }
 0x188   :  { %v1354_v53 = vcombine.low %v1332_v35, %v1339_v48  ;;  %v947_v62 = vadd.f32 %v946_v19, %v859_v61  ;;  %v1469_v1 = vcombine.low %v1164_v51, %v1172_v7  ;;  %v1476_v3 = vrot.slane %v1467_v34, %v2443_v28 }
 0x189   :  { %v1355_v63 = vcombine.low %v1346_v52, %v1353_v60  ;;  %v1483_v6 = vrot.slane %v1468_v36, %v2443_v28  ;;  %v1442_v14 = vrot.slane %v2115_v49, %v2443_v28  ;;  %v1171_v17 = vrot.slane %v1143_v50, %v2443_v28 }
 0x18a   :  { %v1362_v15 = vrot.slane %v1354_v53, %v2443_v28  ;;  %v1497_v24 = vrot.slane %v1174_v13, %v2443_v28  ;;  %v1490_v20 = vrot.slane %v1469_v1, %v2443_v28  ;;  %v1029_v19 = vcombine.high %v947_v62, %v947_v62 }
 0x18b   :  { %v1369_v18 = vrot.slane %v1355_v63, %v2443_v28  ;;  %v1498_v21 = vcombine.low %v1476_v3, %v1483_v6  ;;  %v1157_v23 = vrot.slane %v1141_v44, %v2443_v28  ;;  %v1028_v26 = vcombine.high %v1024_v41, %v1024_v41 }
 0x18c   :  { %v1036_v55 = vrot.slane %v947_v62, %v2443_v28  ;;  %v968_v61 = vadd.f32 %v2172_v56, %v888_v45  ;;  %v1499_v29 = vcombine.low %v1490_v20, %v1497_v24  ;;  %v1043_v8 = vrot.slane %v1029_v19, %v2443_v28 }
 0x18d   :  { %v1370_v16 = vcombine.low %v1362_v15, %v1369_v18  ;;  %v1506_v30 = vrot.slane %v1498_v21, %v2443_v28  ;;  %v1451_v31 = vcombine.low %v1442_v14, %v1449_v59  ;;  %v1515_v25 = vcombine.low %v1157_v23, %v1171_v17 }
 0x18e   :  { %v1044_v32 = vcombine.high %v1036_v55, %v1036_v55  ;;  %v1052_v37 = vrot.slane %v1036_v55, %v2443_v28  ;;  %v1274_v39 = vcombine.high %v968_v61, %v968_v61  ;;  %v1513_v40 = vrot.slane %v1499_v29, %v2443_v28 }
 0x18f   :  { %v1716_v9 = vsel %vm1715_vm5, %v1370_v16, -inf  ;;  %v1045_v41 = vcombine.high %v1043_v8, %v1043_v8  ;;  %v1059_v56 = vrot.slane %v1043_v8, %v2443_v28  ;;  %v1281_v46 = vrot.slane %v968_v61, %v2443_v28 }
 0x190   :  { %v1717_v43 = vrot.slane %v1716_v9, 4  ;;  %v1066_v45 = vrot.slane %v1044_v32, %v2443_v28  ;;  %v1074_v38 = vcombine.high %v1052_v37, %v1052_v37  ;;  %v1514_v42 = vcombine.low %v1506_v30, %v1513_v40 }
 0x191   :  { %v1073_v54 = vrot.slane %v1045_v41, %v2443_v28  ;;  %v1371_v44 = vcombine.low %v1028_v26, %v1052_v37  ;;  %v2116_v33 = vcombine.high %v1157_v23, %v1171_v17  ;;  %v1288_v35 = vrot.slane %v1274_v39, %v2443_v28  ;;  %v962_v41 = vpop.f32.mrf.mxu0 }
 0x192   :  { %v1076_v34 = vcombine.high %v1066_v45, %v1066_v45  ;;  %v1372_v47 = vcombine.low %v1066_v45, %v1074_v38  ;;  %v1524_v48 = vrot.slane %v1515_v25, %v2443_v28  ;;  %v1737_v49 = vsel %vm1715_vm5, %v1514_v42, -inf }
 0x193   :  { %v1380_v60 = vrot.slane %v1371_v44, %v2443_v28  ;;  %v2114_v50 = vcombine.high %v1059_v56, %v1073_v54  ;;  %v1718_v51 = vmax.f32 %v1716_v9, %v1717_v43  ;;  %v1738_v52 = vrot.slane %v1737_v49, 4 }
 0x194   :  { %v1373_v53 = vcombine.low %v1076_v34, %v1059_v56  ;;  %v1387_v7 = vrot.slane %v1372_v47, %v2443_v28  ;;  %v1289_v59 = vcombine.high %v1281_v46, %v1281_v46  ;;  %v1290_v13 = vcombine.high %v1288_v35, %v1288_v35 }
 0x195   :  { %v1428_v36 = vrot.slane %v2114_v50, %v2443_v28  ;;  %v2714_v62 = vrot.slane %v1281_v46, %v2443_v28  ;;  %v1531_v63 = vrot.slane %v2116_v33, %v2443_v28  ;;  %v1401_v3 = vrot.slane %v1073_v54, %v2443_v28 }
 0x196   :  { %v1394_v1 = vrot.slane %v1373_v53, %v2443_v28  ;;  %v1402_v6 = vcombine.low %v1380_v60, %v1387_v7  ;;  %v1304_v15 = vrot.slane %v1288_v35, %v2443_v28  ;;  %v1311_v17 = vrot.slane %v1289_v59, %v2443_v28 }
 0x197   :  { %v1450_v14 = vcombine.low %v1428_v36, %v2684_v57  ;;  %v1318_v24 = vrot.slane %v1290_v13, %v2443_v28  ;;  %v1465_v18 = vrot.slane %v1451_v31, %v2443_v28  ;;  %v1719_v20 = vrot.slane %v1718_v51, 2 }
 0x198   :  { %v1739_v21 = vmax.f32 %v1737_v49, %v1738_v52  ;;  %v1403_v19 = vcombine.low %v1394_v1, %v1401_v3  ;;  %v1319_v26 = vcombine.high %v2714_v62, %v2714_v62  ;;  %v1320_v55 = vcombine.high %v1304_v15, %v1304_v15 }
 0x199   :  { %v1458_v23 = vrot.slane %v1450_v14, %v2443_v28  ;;  %v1321_v61 = vcombine.high %v1311_v17, %v1311_v17  ;;  %v1546_v16 = vcombine.low %v1524_v48, %v1531_v63  ;;  %v1410_v57 = vrot.slane %v1402_v6, %v2443_v28 }
 0x19a   :  { %v1417_v29 = vrot.slane %v1403_v19, %v2443_v28  ;;  %v1322_v30 = vcombine.high %v1318_v24, %v1318_v24  ;;  %v1659_v32 = vcombine.low %v1311_v17, %v1319_v26  ;;  %v887_v31 = vcombine.low %v2647_v12, %v2625_v11 }
 0x19b   :  { %v1466_v8 = vcombine.low %v1458_v23, %v1465_v18  ;;  %v1660_v37 = vcombine.low %v1321_v61, %v1304_v15  ;;  %v2731_v39 = vmax.f32 %v1718_v51, %v1719_v20  ;;  %v1740_v9 = vrot.slane %v1739_v21, 2 }
 0x19c   :  { %v1418_v40 = vcombine.low %v1410_v57, %v1417_v29  ;;  %v1661_v25 = vcombine.low %v1318_v24, %v1320_v55  ;;  %v1668_v56 = vrot.slane %v1659_v32, %v2443_v28  ;;  %v1689_v38 = vrot.slane %v1322_v30, %v2443_v28 }
 0x19d   :  { %v1730_v43 = vsel %vm1715_vm5, %v1466_v8, -inf  ;;  %v1675_v45 = vrot.slane %v1660_v37, %v2443_v28  ;;  %v2738_v42 = vrot.slane %v1546_v16, %v2443_v28  ;;  %v960_v33 = vadd.f32 %v2668_v0, %v886_v2 }
 0x19e   :  { %v1723_v54 = vsel %vm1715_vm5, %v1418_v40, -inf  ;;  %v1731_v11 = vrot.slane %v1730_v43, 4  ;;  %v1682_v12 = vrot.slane %v1661_v25, %v2443_v28  ;;  %v963_v34 = vadd.f32 %v962_v41, %v887_v31 }
 0x19f   :  { %v1724_v44 = vrot.slane %v1723_v54, 4  ;;  %v1690_v46 = vcombine.low %v1668_v56, %v1675_v45  ;;  %v1721_v47 = vrot.slane %v2731_v39, 1  ;;  %v2747_v35 = vmax.f32 %v1739_v21, %v1740_v9 }
 0x1a0   :  { %v1732_v48 = vmax.f32 %v1730_v43, %v1731_v11  ;;  %v1691_v49 = vcombine.low %v1682_v12, %v1689_v38  ;;  %v1176_v51 = vcombine.high %v960_v33, %v960_v33  ;;  %v1183_v52 = vrot.slane %v960_v33, %v2443_v28 }
 0x1a1   :  { %v1725_v60 = vmax.f32 %v1723_v54, %v1724_v44  ;;  %v1698_v50 = vrot.slane %v1690_v46, %v2443_v28  ;;  %v1225_v36 = vcombine.high %v963_v34, %v963_v34  ;;  %v1232_v5 = vrot.slane %v963_v34, %v2443_v28 }
 0x1a2   :  { %v1733_v53 = vrot.slane %v1732_v48, 2  ;;  %v1705_v7 = vrot.slane %v1691_v49, %v2443_v28  ;;  %v1190_v0 = vrot.slane %v1176_v51, %v2443_v28  ;;  %v1191_v2 = vcombine.high %v1183_v52, %v1183_v52 }
 0x1a3   :  { %v1726_v10 = vrot.slane %v1725_v60, 2  ;;  %v1199_v59 = vrot.slane %v1183_v52, %v2443_v28  ;;  %v1742_v13 = vrot.slane %v2747_v35, 1  ;;  %v1239_v3 = vrot.slane %v1225_v36, %v2443_v28 }
 0x1a4   :  { %v1734_v63 = vmax.f32 %v1732_v48, %v1733_v53  ;;  %v1706_v1 = vcombine.low %v1698_v50, %v1705_v7  ;;  %v1192_v14 = vcombine.high %v1190_v0, %v1190_v0  ;;  %v1206_v15 = vrot.slane %v1190_v0, %v2443_v28 }
 0x1a5   :  { %v1727_v6 = vmax.f32 %v1725_v60, %v1726_v10  ;;  %v1213_v17 = vrot.slane %v1191_v2, %v2443_v28  ;;  %v1221_v18 = vcombine.high %v1199_v59, %v1199_v59  ;;  %v1240_v20 = vcombine.high %v1232_v5, %v1232_v5 }
 0x1a6   :  { %v1735_v24 = vrot.slane %v1734_v63, 1  ;;  %v1241_v21 = vcombine.high %v1239_v3, %v1239_v3  ;;  %v1220_v23 = vrot.slane %v1192_v14, %v2443_v28  ;;  %v1222_v26 = vcombine.high %v1206_v15, %v1206_v15 }
 0x1a7   :  { %v1728_v19 = vrot.slane %v1727_v6, 1  ;;  %v1223_v55 = vcombine.high %v1213_v17, %v1213_v17  ;;  %v1517_v61 = vcombine.low %v1199_v59, %v1213_v17  ;;  %v1545_v16 = vrot.slane %v1221_v18, %v2443_v28 }
 0x1a8   :  { %v1248_v57 = vrot.slane %v1232_v5, %v2443_v28  ;;  %v1255_v29 = vrot.slane %v1239_v3, %v2443_v28  ;;  %v1564_v32 = vcombine.low %v1220_v23, %v1222_v26  ;;  %v1224_v37 = vcombine.high %v1220_v23, %v1220_v23 }
 0x1a9   :  { %v1729_v30 = vmax.f32 %v1727_v6, %v1728_v19  ;;  %v1563_v8 = vcombine.low %v1223_v55, %v1206_v15  ;;  %v1538_v31 = vrot.slane %v1517_v61, %v2443_v28  ;;  %v1262_v9 = vrot.slane %v1240_v20, %v2443_v28 }
 0x1aa   :  { %v1269_v40 = vrot.slane %v1241_v21, %v2443_v28  ;;  %v1765_v25 = vsel %vm1715_vm5, %v1706_v1, -inf  ;;  %v1736_v41 = vmax.f32 %v1734_v63, %v1735_v24  ;;  %v1579_v56 = vrot.slane %v1564_v32, %v2443_v28 }
 0x1ab   :  { %v1572_v43 = vrot.slane %v1563_v8, %v2443_v28  ;;  %v1565_v45 = vcombine.low %v1224_v37, %v1248_v57  ;;  %v1547_v38 = vcombine.low %v1538_v31, %v1545_v16  ;;  %v1593_v54 = vrot.slane %v1262_v9, %v2443_v28 }
 0x1ac   :  { %v2117_v11 = vcombine.high %v1248_v57, %v1262_v9  ;;  %v1612_v12 = vcombine.low %v1255_v29, %v1269_v40  ;;  %v2118_v33 = vcombine.high %v1255_v29, %v1269_v40  ;;  %v1766_v34 = vrot.slane %v1765_v25, 4 }
 0x1ad   :  { %v1594_v44 = vcombine.low %v1572_v43, %v1579_v56  ;;  %v1586_v46 = vrot.slane %v1565_v45, %v2443_v28  ;;  %v1777_v48 = vadd.f32 %v2657_v27, %v1729_v30  ;;  %v1561_v49 = vrot.slane %v1547_v38, %v2443_v28 }
 0x1ae   :  { %v1620_v60 = vrot.slane %v2117_v11, %v2443_v28  ;;  %v1627_v50 = vrot.slane %v1612_v12, %v2443_v28  ;;  %v1641_v51 = vrot.slane %v2714_v62, %v2443_v28  ;;  %v1634_v53 = vrot.slane %v2118_v33, %v2443_v28 }
 0x1af   :  { %v1595_v52 = vcombine.low %v1586_v46, %v1593_v54  ;;  %v1767_v7 = vmax.f32 %v1765_v25, %v1766_v34  ;;  %v1722_v36 = vmax.f32 %v2731_v39, %v1721_v47  ;;  %v1562_v5 = vcombine.low %v2738_v42, %v1561_v49 }
 0x1b0   :  { %v1642_v10 = vcombine.low %v1620_v60, %v1627_v50  ;;  %v1778_v0 = vadd.f32 %v2657_v27, %v1736_v41  ;;  %v1602_v2 = vrot.slane %v1594_v44, %v2443_v28  ;;  %v1643_v63 = vcombine.low %v1634_v53, %v1641_v51 }
 0x1b1   :  { %v1609_v59 = vrot.slane %v1595_v52, %v2443_v28  ;;  %v1768_v1 = vrot.slane %v1767_v7, 2  ;;  %v1743_v62 = vmax.f32 %v2747_v35, %v1742_v13  ;;  %v1744_v3 = vsel %vm1715_vm5, %v1562_v5, -inf }
 0x1b2   :  { %v1650_v6 = vrot.slane %v1642_v10, %v2443_v28  ;;  %v1785_v14 = vmax.f32 %v1777_v48, 0.0  ;;  %v1745_v15 = vrot.slane %v1744_v3, 4  ;;  %v1657_v42 = vrot.slane %v1643_v63, %v2443_v28 }
 0x1b3   :  { %v1610_v39 = vcombine.low %v1602_v2, %v1609_v59  ;;  %v1769_v47 = vmax.f32 %v1767_v7, %v1768_v1  ;;  %v1776_v17 = vadd.f32 %v2657_v27, %v1722_v36  ;;  %v1786_v24 = vmax.f32 %v1778_v0, 0.0 }
 0x1b4   :  { %v1746_v18 = vmax.f32 %v1744_v3, %v1745_v15  ;;  %v1658_v20 = vcombine.low %v1650_v6, %v1657_v42  ;;  %v1779_v35 = vadd.f32 %v2657_v27, %v1743_v62  ;;  %v1825_v13 = vpack.c.bf16 %v1785_v14, %v1785_v14 }
 0x1b5   :  { %v1751_v21 = vsel %vm1715_vm5, %v1610_v39, -inf  ;;  %v1770_v19 = vrot.slane %v1769_v47, 1  ;;  %v1784_v57 = vmax.f32 %v1776_v17, 0.0  ;;  %v1826_v30 = vpack.c.bf16 %v1786_v24, %v1786_v24 }
 0x1b6   :  { %v1752_v23 = vrot.slane %v1751_v21, 4  ;;  %v1747_v26 = vrot.slane %v1746_v18, 2  ;;  %v1758_v55 = vsel %vm1715_vm5, %v1658_v20, -inf  ;;  %v1787_v37 = vmax.f32 %v1779_v35, 0.0 }
 0x1b7   :  { %v1759_v16 = vrot.slane %v1758_v55, 4  ;;  %v1771_v29 = vmax.f32 %v1769_v47, %v1770_v19  ;;  %v1845_v31 = vunpack.c.l.b16 %v1825_v13  ;;  %v1824_v41 = vpack.c.bf16 %v1784_v57, %v1784_v57  ;;  %v2257_v19 = vld [vmem:[#allocation2 + $0x60] sm:$0xff]  }
 0x1b8   :  { %v1753_v61 = vmax.f32 %v1751_v21, %v1752_v23  ;;  %v1748_v28 = vmax.f32 %v1746_v18, %v1747_v26  ;;  %v1846_v45 = vunpack.c.l.b16 %v1826_v30  ;;  %v1827_v11 = vpack.c.bf16 %v1787_v37, %v1787_v37  ;;  %2207 = vmatpush3.bf16.msra.mxu0 %v2257_v19  ;;  %v2258_v23 = vld [vmem:[#allocation2 + $0x58] sm:$0xff]  }
 0x1b9   :  { %v1760_v32 = vmax.f32 %v1758_v55, %v1759_v16  ;;  %v1783_v56 = vadd.f32 %v2657_v27, %v1771_v29  ;;  %v1852_v12 = vrot.slane %v1845_v31, 7  ;;  %v1844_v34 = vunpack.c.l.b16 %v1824_v41  ;;  %2208 = vmatprep.subr.bf16.mxu0 %v2309_v58 }
 0x1ba   :  { %v1754_v8 = vrot.slane %v1753_v61, 2  ;;  %v1749_v9 = vrot.slane %v1748_v28, 1  ;;  %v1855_v60 = vrot.slane %v1846_v45, 6  ;;  %v1847_v52 = vunpack.c.l.b16 %v1827_v11 }
 0x1bb   :  { %v1761_v25 = vrot.slane %v1760_v32, 2  ;;  %v1791_v49 = vmax.f32 %v1783_v56, 0.0  ;;  %v1854_v53 = vsel %vm1853_vm6, %v1852_v12, %v1844_v34  ;;  %v1834_v35 = vsub.s32 1, %v2440_v22 }
 0x1bc   :  { %v1755_v40 = vmax.f32 %v1753_v61, %v1754_v8  ;;  %v1750_v43 = vmax.f32 %v1748_v28, %v1749_v9  ;;  %v1857_v2 = vsel %vm1856_vm7, %v1855_v60, %v1854_v53  ;;  %v1858_v1 = vrot.slane %v1847_v52, 5  ;;  %2209 = vmatpush3.bf16.msra.mxu0 %v2258_v23 }
 0x1bd   :  { %v1762_v54 = vmax.f32 %v1760_v32, %v1761_v25  ;;  %v1831_v10 = vpack.c.bf16 %v1791_v49, %v1791_v49  ;;  %v1835_v13 = vrot.slane %v2599_v4, %v1834_v35  ;;  %v1967_v30 = vsub.s32 2, %v2440_v22 }
 0x1be   :  { %v1756_v38 = vrot.slane %v1755_v40, 1  ;;  %v1780_v44 = vadd.f32 %v2657_v27, %v1750_v43  ;;  %v1860_v14 = vsel %vm1859_vm8, %v1858_v1, %v1857_v2 }
 0x1bf   :  { %v1763_v33 = vrot.slane %v1762_v54, 1  ;;  %v1851_v15 = vunpack.c.l.b16 %v1831_v10  ;;  %v1968_v8 = vrot.slane %v2599_v4, %v1967_v30 }
 0x1c0   :  { %v1757_v46 = vmax.f32 %v1755_v40, %v1756_v38  ;;  %v1788_v48 = vmax.f32 %v1780_v44, 0.0 }
 0x1c1   :  { %v1764_v50 = vmax.f32 %v1762_v54, %v1763_v33  ;;  %v1870_v24 = vrot.slane %v1851_v15, 1 }
 0x1c2   :  { %v1781_v51 = vadd.f32 %v2657_v27, %v1757_v46  ;;  %v1828_v7 = vpack.c.bf16 %v1788_v48, %v1788_v48 }
 0x1c3   :  { %v1782_v36 = vadd.f32 %v2657_v27, %v1764_v50 }
 0x1c4   :  { %v1789_v5 = vmax.f32 %v1781_v51, 0.0  ;;  %v1848_v0 = vunpack.c.l.b16 %v1828_v7 }
 0x1c5   :  { %v1790_v59 = vmax.f32 %v1782_v36, 0.0 }
 0x1c6   :  { %v1829_v63 = vpack.c.bf16 %v1789_v5, %v1789_v5  ;;  %v1861_v62 = vrot.slane %v1848_v0, 4 }
 0x1c7   :  { %v1830_v3 = vpack.c.bf16 %v1790_v59, %v1790_v59 }
 0x1c8   :  { %v1849_v6 = vunpack.c.l.b16 %v1829_v63  ;;  %v1863_v47 = vsel %vm1862_vm9, %v1861_v62, %v1860_v14 }
 0x1c9   :  { %v1850_v39 = vunpack.c.l.b16 %v1830_v3 }
 0x1ca   :  { %v1864_v42 = vrot.slane %v1849_v6, 3 }
 0x1cb   :  { %v1867_v17 = vrot.slane %v1850_v39, 2 }
 0x1cc   :  { %v1866_v27 = vsel %vm1865_vm10, %v1864_v42, %v1863_v47 }
 0x1cd   :  { %v1869_v18 = vsel %vm1868_vm11, %v1867_v17, %v1866_v27 }
 0x1ce   :  { %v1872_v20 = vsel %vm1871_vm12, %v1870_v24, %v1869_v18 }
 0x1cf   :  { %v1873_v21 = vpack.c.b16 %v1872_v20, %v1872_v20 }
 0x1d1   :  { %2191 = vmatmul.mubr.bf16.vlgmr.msra.gmra.mxu1 %v1873_v21 }
 0x291   :  { %v1957_v26 = vpop.f32.mrf.mxu1 }
 0x292   :  { %v1958_v55 = vadd.f32 %v1957_v26, %v1835_v13 }
 0x293   :  { %v2192_v61 = vpop.f32.mrf.mxu1 }
 0x294   :  { %v1963_v16 = vmax.f32 %v1958_v55, 0.0 }
 0x295   :  { %v1960_v57 = vpop.f32.mrf.mxu1 }
 0x296   :  { %v1964_v28 = vpack.c.bf16 %v1963_v16, %v1963_v16 }
 0x297   :  { %v2193_v29 = vpop.f32.mrf.mxu1 }
 0x298   :  { %2211 = vmatmul.mubr.bf16.vlgmr.msra.gmra.mxu0 %v1964_v28 }
 0x358   :  { %v2051_v58 = vpop.f32.mrf.mxu0 }
 0x359   :  { %v2052_v32 = vadd.f32 %v2051_v58, %v1968_v8 }
 0x35a   :  { %v2212_v37 = vpop.f32.mrf.mxu0 }
 0x35b   :  { %2057 = vst [vmem:[#allocation5] sm:$0xff] %v2052_v32 }
 0x35c   :  { %v2054_v31 = vpop.f32.mrf.mxu0 }
 0x35d   :  { %2290 = shalt.err (!%p2287_p9)
}
 0x35e   :  { %2067 = dma.vmem_to_hbm [thread:$0]  %s2065_s25, 128, %s2808_s3, [#allocation4]   ;;  %v2213_v22 = vpop.f32.mrf.mxu0 }
 0x35f   :  { %2301 = dma.done.wait [#allocation4], 128  }
 0x360   :  { %2302 = vsyncadd [#allocation4], 4294967168 }
 0x361   :  { %2071 = vsyncpa [#allocation3], 1 }
 0x362   :  { %2072 = vsyncpa [#allocation4], 1 }

</bundles_post_ra>
